<compile_context>
chip_gen: v5e
topology: v5e:2x2
jax: 0.10.0
libtpu: 0.0.40
codegen_flags: <defaults>
</compile_context>

<pallas_src>
import jax
import jax.numpy as jnp
from jax.experimental import pallas as pl
from jax.experimental.pallas import tpu as pltpu


def _round_up(x, m):
    return ((x + m - 1) // m) * m


def _cdiv(a, b):
    return -(-a // b)


def _pick_tile(dim, target, align):
    """Largest tile <= ~target, align-multiple, minimizing padding of `dim`
    (e.g. M=520 with target 512 -> tile 520, not 512 with Mp=1024)."""
    if dim <= target:
        return _round_up(dim, align)
    nblocks = _cdiv(dim, target)
    return _round_up(_cdiv(dim, nblocks), align)


def _chip_generation():
    try:
        kind = jax.devices()[0].device_kind.lower()
    except Exception:
        kind = ""
    if "v7" in kind:
        return "v7x"
    if "v6" in kind:
        return "v6e"
    if "v5" in kind:
        return "v5e"
    return "unknown"


def _vmem_capacity_bytes():
    try:
        return int(pltpu.get_tpu_info().vmem_capacity_bytes)
    except Exception:  # pragma: no cover - conservative fallback
        return 64 << 20


def fc_relu_kernel(x_ref, w_ref, b_ref, o_ref):
    """Single-shot output tile: full K panel in VMEM, no accumulator, no branches."""
    y = jnp.dot(x_ref[...], w_ref[...], preferred_element_type=jnp.float32)
    y = y + b_ref[...].astype(jnp.float32)  # (1, tn) broadcasts over rows
    o_ref[...] = jnp.maximum(y, 0.0).astype(o_ref.dtype)


def fc_relu_kernel_kgrid(x_ref, w_ref, b_ref, o_ref, acc_ref):
    """K-tiled variant: f32 accumulator, bias + ReLU epilogue on the last K step."""
    k = pl.program_id(2)
    prod = jnp.dot(x_ref[...], w_ref[...], preferred_element_type=jnp.float32)

    @pl.when(k == 0)
    def _():
        acc_ref[...] = prod  # first step: plain store (no zero-fill + add pass)

    @pl.when(k > 0)
    def _():
        acc_ref[...] += prod

    @pl.when(k == pl.num_programs(2) - 1)
    def _():
        y = acc_ref[...] + b_ref[...].astype(jnp.float32)
        o_ref[...] = jnp.maximum(y, 0.0).astype(o_ref.dtype)


def fc_layer(x, w, b, *, tile_m=None, tile_n=None, tile_k=None, compute_dtype=None):
    """ReLU(x @ w + b) via a tiled Pallas TPU kernel.

    x: (M, K)
    w: (K, N)   (already transposed from PyTorch's (N, K))
    b: (N,)
    compute_dtype: optional operand dtype for the MXU (e.g. jnp.bfloat16).
      Accumulation is always f32; the output keeps x's original dtype.
    """
    M, K = x.shape
    K2, N = w.shape
    assert K == K2 and b.shape == (N,)
    out_dtype = x.dtype

    if compute_dtype is not None and compute_dtype != x.dtype:
        x = x.astype(compute_dtype)
        w = w.astype(compute_dtype)

    gen = _chip_generation()
    vmem_cap = _vmem_capacity_bytes()

    # Roofline-aware tile targets.  The output tile sets arithmetic intensity
    # (AI ~ tm*tn/(tm+tn) flop/byte); MXU-bound needs ~650 (v6e), ~310 (v7x),
    # ~240 (v5e) at bf16.  tk only sets per-step buffer size / step count.
    if gen == "v6e":
        tm_t, tn_t, tk_t = 1024, 1024, 512
    elif gen == "v7x":
        tm_t, tn_t, tk_t = 1024, 1024, 512
    elif gen == "v5e":
        tm_t, tn_t, tk_t = 512, 768, 512
    else:
        tm_t, tn_t, tk_t = 512, 512, 512
    if tile_m is not None:
        tm_t = _round_up(tile_m, 8)
    if tile_n is not None:
        tn_t = _round_up(tile_n, 128)
    if tile_k is not None:
        tk_t = _round_up(tile_k, 128)

    tm = _pick_tile(M, tm_t, 8)
    tn = _pick_tile(N, tn_t, 128)

    # v7x has 2 TensorCores: make sure at least one "parallel" grid axis has
    # >= 2 blocks, otherwise one core idles.
    if gen == "v7x" and tile_n is None and M <= tm and N > 128 and N <= tn:
        tn = max(128, _round_up(_cdiv(N, 2), 128))

    x_item = jnp.dtype(x.dtype).itemsize
    w_item = jnp.dtype(w.dtype).itemsize
    b_item = jnp.dtype(b.dtype).itemsize
    o_item = jnp.dtype(out_dtype).itemsize

    # VMEM budget ceiling: ~0.7x physical capacity (per-TensorCore on v7x).
    vmem_cap_budget = int(0.7 * vmem_cap)

    Mp = _round_up(M, tm)
    Np = _round_up(N, tn)

    # If the full-K panels fit comfortably in VMEM (typical FC layers), drop
    # the K grid axis entirely: no accumulator RMW, no per-K-step overhead,
    # and K needs no padding at all (block K dim == full array dim).
    collapse_fp = (2 * (tm * K * x_item + K * tn * w_item + tn * b_item)
                   + 2 * tm * tn * o_item)
    collapse_k = 2 * collapse_fp <= vmem_cap_budget

    if collapse_k:
        xp = x if Mp == M else jnp.pad(x, ((0, Mp - M), (0, 0)))
        # TODO(synk): in a real layer, pre-pad/transpose W once at init; the
        # per-call jnp.pad is an extra HBM read+write of the weight matrix.
        wp = w if Np == N else jnp.pad(w, ((0, 0), (0, Np - N)))
        bp = (b if Np == N else jnp.pad(b, (0, Np - N))).reshape(1, Np)

        grid = (Mp // tm, Np // tn)
        vmem_limit = int(min(max(2 * collapse_fp, 16 << 20), vmem_cap_budget))

        out_p = pl.pallas_call(
            fc_relu_kernel,
            out_shape=jax.ShapeDtypeStruct((Mp, Np), out_dtype),
            grid_spec=pltpu.PrefetchScalarGridSpec(
                num_scalar_prefetch=0,
                grid=grid,
                in_specs=[
                    pl.BlockSpec((tm, K), lambda i, j: (i, 0)),   # x panel
                    pl.BlockSpec((K, tn), lambda i, j: (0, j)),   # w panel
                    pl.BlockSpec((1, tn), lambda i, j: (0, j)),   # bias tile
                ],
                out_specs=pl.BlockSpec((tm, tn), lambda i, j: (i, j)),
            ),
            compiler_params=pltpu.CompilerParams(
                dimension_semantics=("parallel", "parallel"),
                vmem_limit_bytes=vmem_limit,
            ),
        )(xp, wp, bp)
        return out_p[:M, :N]

    # K-tiled fallback (very large K or tiles): f32 accumulator over K axis.
    tk = _pick_tile(K, tk_t, 128)
    Kp = _round_up(K, tk)
    xp = x if (Mp == M and Kp == K) else jnp.pad(x, ((0, Mp - M), (0, Kp - K)))
    wp = w if (Kp == K and Np == N) else jnp.pad(w, ((0, Kp - K), (0, Np - N)))
    bp = (b if Np == N else jnp.pad(b, (0, Np - N))).reshape(1, Np)

    grid = (Mp // tm, Np // tn, Kp // tk)

    footprint = (2 * (tm * tk * x_item + tk * tn * w_item + tn * b_item)
                 + 2 * tm * tn * o_item
                 + tm * tn * 4)  # f32 accumulator scratch
    vmem_limit = int(min(max(2 * footprint, 16 << 20), vmem_cap_budget))

    w_map = lambda i, j, k: (k, j)
    w_spec = pl.BlockSpec((tk, tn), w_map)
    if gen == "v5e":
        # Lowest-HBM-bandwidth generation: deeper prefetch on the weight panel.
        try:
            w_spec = pl.BlockSpec((tk, tn), w_map, pipeline_mode=pl.Buffered(3))
        except Exception:
            pass  # older jax: fall back to default double buffering

    out_p = pl.pallas_call(
        fc_relu_kernel_kgrid,
        out_shape=jax.ShapeDtypeStruct((Mp, Np), out_dtype),
        grid_spec=pltpu.PrefetchScalarGridSpec(
            num_scalar_prefetch=0,
            grid=grid,
            in_specs=[
                pl.BlockSpec((tm, tk), lambda i, j, k: (i, k)),  # x tile
                w_spec,                                          # w tile
                pl.BlockSpec((1, tn), lambda i, j, k: (0, j)),   # bias tile
            ],
            out_specs=pl.BlockSpec((tm, tn), lambda i, j, k: (i, j)),
            scratch_shapes=[pltpu.VMEM((tm, tn), jnp.float32)],
        ),
        compiler_params=pltpu.CompilerParams(
            dimension_semantics=("parallel", "parallel", "arbitrary"),
            vmem_limit_bytes=vmem_limit,
        ),
    )(xp, wp, bp)

    return out_p[:M, :N]


if __name__ == "__main__":
    # Small shapes consistent with FCLayer(input_size=32, output_size=32), batch=8.
    batch, input_size, output_size = 8, 32, 32

    key = jax.random.PRNGKey(0)
    kx, kw, kb = jax.random.split(key, 3)

    # Deterministic parameter init (mimics PyTorch Linear's uniform(-1/sqrt(in), 1/sqrt(in))).
    bound = 1.0 / (input_size ** 0.5)
    w_pt = jax.random.uniform(kw, (output_size, input_size), jnp.float32, -bound, bound)
    b = jax.random.uniform(kb, (output_size,), jnp.float32, -bound, bound)
    w = w_pt.T  # (input_size, output_size) for the kernel layout
    x = jax.random.normal(kx, (batch, input_size), jnp.float32)

    # f32 path: exact semantics of torch.relu(nn.Linear(x)).
    out = jax.block_until_ready(fc_layer(x, w, b))
    ref = jnp.maximum(x @ w + b, 0.0)
    assert out.shape == (batch, output_size)
    assert jnp.allclose(out, ref, atol=1e-5, rtol=1e-5)

    # bf16 operand path (perf option: halves HBM traffic, full MXU rate),
    # accumulation still f32 — looser tolerance because operands are rounded.
    out_bf16 = jax.block_until_ready(fc_layer(x, w, b, compute_dtype=jnp.bfloat16))
    assert jnp.allclose(out_bf16, ref, atol=5e-2, rtol=5e-2)

    print("KERNEL_OK")
</pallas_src>

<mosaic_0001>
module attributes {stable_mosaic.version = 11 : i64} {
  func.func @fc_relu_kernel(%arg0: i32, %arg1: i32, %arg2: memref<8x32xf32, #tpu.memory_space<vmem>>, %arg3: memref<32x128xf32, #tpu.memory_space<vmem>>, %arg4: memref<1x128xf32, #tpu.memory_space<vmem>>, %arg5: memref<8x128xf32, #tpu.memory_space<vmem>>) attributes {dimension_semantics = [#tpu.dimension_semantics<parallel>, #tpu.dimension_semantics<parallel>], iteration_bounds = array<i64: 1, 1>, scalar_prefetch = 0 : i64, scratch_operands = 0 : i64, tpu.core_type = #tpu.core_type<tc>, window_params = [{transform_indices = @transform_0, window_bounds = array<i64: 8, 32>}, {transform_indices = @transform_1, window_bounds = array<i64: 32, 128>}, {transform_indices = @transform_2, window_bounds = array<i64: 1, 128>}, {transform_indices = @transform_3, window_bounds = array<i64: 8, 128>}]} {
    %c0 = arith.constant 0 : index
    %c0_0 = arith.constant 0 : index
    %0 = vector.load %arg2[%c0, %c0_0] : memref<8x32xf32, #tpu.memory_space<vmem>>, vector<8x32xf32>
    %c0_1 = arith.constant 0 : index
    %c0_2 = arith.constant 0 : index
    %1 = vector.load %arg3[%c0_1, %c0_2] : memref<32x128xf32, #tpu.memory_space<vmem>>, vector<32x128xf32>
    %cst = arith.constant dense<0.000000e+00> : vector<8x128xf32>
    %2 = tpu.matmul %0, %1, %cst {dimension_numbers = #tpu.dot_dimension_numbers<[1], [0], [0], [1], [0, 0, 1, 1], [], []>} : vector<8x32xf32>, vector<32x128xf32>, vector<8x128xf32> -> vector<8x128xf32>
    %c0_3 = arith.constant 0 : index
    %c0_4 = arith.constant 0 : index
    %3 = vector.load %arg4[%c0_3, %c0_4] : memref<1x128xf32, #tpu.memory_space<vmem>>, vector<1x128xf32>
    %4 = vector.broadcast %3 : vector<1x128xf32> to vector<8x128xf32>
    %5 = arith.addf %2, %4 : vector<8x128xf32>
    %cst_5 = arith.constant 0.000000e+00 : f32
    %6 = vector.broadcast %cst_5 : f32 to vector<8x128xf32>
    %7 = arith.maximumf %5, %6 : vector<8x128xf32>
    %c0_6 = arith.constant 0 : index
    %c0_7 = arith.constant 0 : index
    %8 = vector.load %arg5[%c0_6, %c0_7] : memref<8x128xf32, #tpu.memory_space<vmem>>, vector<8x128xf32>
    tpu.vector_store %arg5[%c0_6, %c0_7], %7 {strides = array<i32>} : memref<8x128xf32, #tpu.memory_space<vmem>>, vector<8x128xf32>,
    return
  }
  func.func @transform_0(%arg0: i32, %arg1: i32) -> (i32, i32) {
    %c0_i32 = arith.constant 0 : i32
    %c0_i32_0 = arith.constant 0 : i32
    return %arg0, %c0_i32 : i32, i32
  }
  func.func @transform_1(%arg0: i32, %arg1: i32) -> (i32, i32) {
    %c0_i32 = arith.constant 0 : i32
    %c0_i32_0 = arith.constant 0 : i32
    return %c0_i32, %arg1 : i32, i32
  }
  func.func @transform_2(%arg0: i32, %arg1: i32) -> (i32, i32) {
    %c0_i32 = arith.constant 0 : i32
    %c0_i32_0 = arith.constant 0 : i32
    return %c0_i32, %arg1 : i32, i32
  }
  func.func @transform_3(%arg0: i32, %arg1: i32) -> (i32, i32) {
    %c0_i32 = arith.constant 0 : i32
    return %arg0, %arg1 : i32, i32
  }
}

</mosaic_0001>

<bundles_post_ra>
// kernel: tpu_custom_call.1
= control target key start
LH: loop header
LB: loop body
LE: loop exit
PB: predicated region body
PF: predicated region fallthrough
CT: control target
= control target key end

     0   :  { %8 = vsyncpa [#allocation3], 0  ;;  %s220_s0 = inlined_call_operand.hbm [shape: f32[8,32], index: 0, kind: input, shape index: {}]   ;;  %s221_s1 = inlined_call_operand.hbm [shape: f32[32,128], index: 1, kind: input, shape index: {}]   ;;  %s222_s2 = inlined_call_operand.vmem [shape: f32[1,128], index: 2, kind: input, shape index: {}]   ;;  %s223_s3 = inlined_call_operand.hbm [shape: f32[8,128], index: 3, kind: output, shape index: {}]  }
   0x1   :  { %9 = vsyncpa [#allocation6], 0 }
   0x2   :  { %10 = vsyncpa [#allocation4], 0  ;;  %s16_s14 = sshll.u32 %s220_s0, 4  ;;  %s183_s15 = smov [#allocation2]   ;;  %s17_s14 = int_to_ptr.hbm [resolvable:$true] %s16_s14 }
   0x3   :  { %s18_s16 = sshll.u32 %s183_s15, 4  ;;  %s26_s19 = sshll.u32 %s221_s1, 4  ;;  %s19_s16 = int_to_ptr.vmem [resolvable:$true] %s18_s16  ;;  %s27_s19 = int_to_ptr.hbm [resolvable:$true] %s26_s19 }
   0x4   :  { %21 = dma.hbm_to_vmem [thread:$0]  %s17_s14, 128, %s19_s16, [#allocation3]  }
   0x5   :  { %s184_s20 = smov [#allocation5]   ;;  %s185_s22 = smov 128  }
   0x6   :  { %s28_s21 = sshll.u32 %s184_s20, 4  ;;  %s186_s23 = smov 8   ;;  %s29_s21 = int_to_ptr.vmem [resolvable:$true] %s28_s21 }
   0x7   :  { %34 = dma.hbm_to_vmem [thread:$0]  %s27_s19, 512, %s29_s21, [#allocation6], %s185_s22, %s185_s22, %s186_s23  }
   0x8   :  { %177 = dma.done.wait [#allocation3], 128  }
   0x9   :  { %178 = vsyncadd [#allocation3], 4294967168 }
   0xa   :  { %179 = dma.done.wait [#allocation6], 512  }
   0xb   :  { %180 = vsyncadd [#allocation6], 4294966784  ;;  %v49_v0 = vld [vmem:[#allocation5 + $0x18] sm:$0xff]  ;;  %v48_v1 = vld [vmem:[#allocation5 + $0x10] sm:$0xff]  ;;  %vm54_vm0 = vcmask 261120   ;;  %s187_s24 = smov [#allocation7]  }
   0xc   :  { %70 = vmatpush.msra.mxu0 %v49_v0  ;;  %v47_v2 = vld [vmem:[#allocation5 + $0x8] sm:$0xff]  ;;  %v46_v3 = vld [vmem:[#allocation5] sm:$0xff]  ;;  %v45_v4 = vld [vmem:[#allocation2] sm:$0xff]  ;;  %s85_s25 = sshll.u32 %s187_s24, 4  ;;  %s87_s28 = sshll.u32 %s223_s3, 4  ;;  %s86_s25 = int_to_ptr.vmem [resolvable:$true] %s85_s25  ;;  %s88_s28 = int_to_ptr.hbm [resolvable:$true] %s87_s28 }
   0xd   :  { %v104_v5 = vld [vmem:[%s222_s2] ss:$0 sm:$0xff] }
   0xe   :  { %71 = vmatpush.msra.mxu0 %v48_v1 }
  0x10   :  { %72 = vmatpush.msra.mxu0 %v47_v2 }
  0x12   :  { %73 = vmatpush.msra.mxu0 %v46_v3 }
  0x13   :  { %98 = vmatmul.msk.f32.vlgmr.msra.gmra.mxu0 %vm54_vm0, %v45_v4 }
  0x90   :  { %v75_v6 = vpop.f32.mrf.mxu0 }
  0x91   :  { %v76_v7 = vadd.f32 %v104_v5, %v75_v6 }
  0x93   :  { %v78_v8 = vmax.f32 %v76_v7, 0.0 }
  0x95   :  { %79 = vst [vmem:[#allocation7] sm:$0xff] %v78_v8 }
  0x96   :  { %90 = dma.vmem_to_hbm [thread:$0]  %s86_s25, 128, %s88_s28, [#allocation4]  }
  0x97   :  { %181 = dma.done.wait [#allocation4], 128  }
  0x98   :  { %182 = vsyncadd [#allocation4], 4294967168 }
  0x99   :  { %95 = vsyncpa [#allocation3], 1 }
  0x9a   :  { %96 = vsyncpa [#allocation6], 1 }
  0x9b   :  { %97 = vsyncpa [#allocation4], 1 }

</bundles_post_ra>
